<compile_context>
chip_gen: v5e
topology: v5e:2x2
jax: 0.10.0
libtpu: 0.0.40
codegen_flags: <defaults>
</compile_context>

<pallas_src>
import functools

import jax
import jax.numpy as jnp
from jax.experimental import pallas as pl
from jax.experimental.pallas import tpu as pltpu

LANE = 128
_MIB = 1024 * 1024


# ----------------------------------------------------------------------------
# helpers
# ----------------------------------------------------------------------------
def _round_up(n, m):
    return ((n + m - 1) // m) * m


def _pad2d(a, rows, cols):
    pr, pc = rows - a.shape[0], cols - a.shape[1]
    if pr == 0 and pc == 0:
        return a
    return jnp.pad(a, ((0, pr), (0, pc)))


def _pick_row_tile(npad):
    """Largest row tile in {512, 256, 128} dividing npad.  256+ keeps the
    v6e/v7x 2x256^2 MXU full and amortizes the ~0.35us/grid-step overhead,
    while a (TM, Npad) bf16 adj block stays well under v7x's 64 MiB VMEM."""
    for tm in (512, 256, 128):
        if npad % tm == 0:
            return tm
    return npad


def _vmem_limit(*buffer_bytes):
    """Scoped-VMEM limit from actual buffer sizes + ~20% headroom, clamped to
    v7x's 64 MiB physical VMEM (defaults: 16 MiB v5e / 32 MiB v6e+)."""
    need = int(sum(buffer_bytes) * 1.2) + _MIB
    return int(min(max(need, 32 * _MIB), 64 * _MIB))


# ----------------------------------------------------------------------------
# kernels
# ----------------------------------------------------------------------------
def _xw_kernel(x_ref, w_ref, o_ref):
    """s1_tile = x_tile @ W1  (f32 MXU accumulation)."""
    o_ref[...] = jnp.dot(x_ref[...], w_ref[...],
                         preferred_element_type=jnp.float32).astype(o_ref.dtype)


def _gc1_kernel(adj_ref, s1_ref, w2_ref, b1_ref, o_ref):
    """s2_tile = relu(adj_tile @ s1 + b1) @ W2.

    F.dropout(..., training=False) between relu and gc2 is the identity.
    """
    h = jnp.dot(adj_ref[...], s1_ref[...], preferred_element_type=jnp.float32)
    h = jnp.maximum(h + b1_ref[...], 0.0)
    o_ref[...] = jnp.dot(h.astype(w2_ref.dtype), w2_ref[...],
                         preferred_element_type=jnp.float32).astype(o_ref.dtype)


def _gc2_kernel(adj_ref, s2_ref, b2_ref, o_ref):
    """out_tile = adj_tile @ s2 + b2."""
    o = jnp.dot(adj_ref[...], s2_ref[...], preferred_element_type=jnp.float32)
    o_ref[...] = (o + b2_ref[...]).astype(o_ref.dtype)


# ----------------------------------------------------------------------------
# forward
# ----------------------------------------------------------------------------
@functools.partial(jax.jit, static_argnames=("compute_dtype",))
def prepare_adj(adj, compute_dtype=jnp.bfloat16):
    """Pad + cast the N x N adjacency ONCE; reuse across forwards so the N^2
    pad/cast HBM pass is hoisted out of the hot path."""
    npad = _round_up(adj.shape[0], LANE)
    return _pad2d(adj, npad, npad).astype(compute_dtype)


@functools.partial(jax.jit, static_argnames=("compute_dtype",))
def _gcn_forward_impl(x, adj, w1, b1, w2, b2, compute_dtype):
    n, nfeat = x.shape
    nhid, nclass = w1.shape[1], w2.shape[1]

    npad = _round_up(adj.shape[0], LANE)
    fpad = _round_up(nfeat, LANE)
    hpad = _round_up(nhid, LANE)
    cpad = _round_up(nclass, LANE)

    # Zero padding is exact: padded adj rows/cols are zero, so the relu(b1)
    # garbage padding produces in h never reaches a real output row.
    adjp = _pad2d(adj, npad, npad).astype(compute_dtype)  # no-op if prepare_adj'd
    xp = _pad2d(x, npad, fpad).astype(compute_dtype)
    w1p = _pad2d(w1, fpad, hpad).astype(compute_dtype)
    w2p = _pad2d(w2, hpad, cpad).astype(compute_dtype)
    b1p = _pad2d(b1.reshape(1, -1), 1, hpad).astype(jnp.float32)
    b2p = _pad2d(b2.reshape(1, -1), 1, cpad).astype(jnp.float32)

    isz = jnp.dtype(compute_dtype).itemsize
    tm = _pick_row_tile(npad)
    grid = (npad // tm,)
    row = lambda i: (i, 0)   # streamed row-tile operand
    rep = lambda i: (0, 0)   # full-resident operand (constant block index)

    # ---- pass 0: s1 = x @ W1 ------------------------------------------------
    s1 = pl.pallas_call(
        _xw_kernel,
        out_shape=jax.ShapeDtypeStruct((npad, hpad), compute_dtype),
        grid=grid,
        in_specs=[pl.BlockSpec((tm, fpad), row),
                  pl.BlockSpec((fpad, hpad), rep)],
        out_specs=pl.BlockSpec((tm, hpad), row),
        compiler_params=pltpu.CompilerParams(
            dimension_semantics=("parallel",),
            vmem_limit_bytes=_vmem_limit(2 * tm * fpad * isz,
                                         2 * fpad * hpad * isz,
                                         2 * tm * hpad * isz)),
        cost_estimate=pl.CostEstimate(
            flops=2 * npad * fpad * hpad, transcendentals=0,
            bytes_accessed=(npad * fpad + fpad * hpad + npad * hpad) * isz),
    )(xp, w1p)

    # ---- pass 1: s2 = relu(adj @ s1 + b1) @ W2   (dropout = identity) --------
    s2 = pl.pallas_call(
        _gc1_kernel,
        out_shape=jax.ShapeDtypeStruct((npad, cpad), compute_dtype),
        grid=grid,
        in_specs=[pl.BlockSpec((tm, npad), row),
                  pl.BlockSpec((npad, hpad), rep),
                  pl.BlockSpec((hpad, cpad), rep),
                  pl.BlockSpec((1, hpad), rep)],
        out_specs=pl.BlockSpec((tm, cpad), row),
        compiler_params=pltpu.CompilerParams(
            dimension_semantics=("parallel",),
            vmem_limit_bytes=_vmem_limit(2 * tm * npad * isz,
                                         2 * npad * hpad * isz,
                                         2 * hpad * cpad * isz,
                                         2 * tm * cpad * isz,
                                         tm * hpad * 4)),
        cost_estimate=pl.CostEstimate(
            flops=2 * npad * npad * hpad + 2 * npad * hpad * cpad,
            transcendentals=0,
            bytes_accessed=(npad * npad + npad * hpad + hpad * cpad
                            + npad * cpad) * isz + hpad * 4),
    )(adjp, s1, w2p, b1p)

    # ---- pass 2: out = adj @ s2 + b2 ------------------------------------------
    out = pl.pallas_call(
        _gc2_kernel,
        out_shape=jax.ShapeDtypeStruct((npad, cpad), jnp.float32),
        grid=grid,
        in_specs=[pl.BlockSpec((tm, npad), row),
                  pl.BlockSpec((npad, cpad), rep),
                  pl.BlockSpec((1, cpad), rep)],
        out_specs=pl.BlockSpec((tm, cpad), row),
        compiler_params=pltpu.CompilerParams(
            dimension_semantics=("parallel",),
            vmem_limit_bytes=_vmem_limit(2 * tm * npad * isz,
                                         2 * npad * cpad * isz,
                                         2 * tm * cpad * 4)),
        cost_estimate=pl.CostEstimate(
            flops=2 * npad * npad * cpad, transcendentals=0,
            bytes_accessed=(npad * npad + npad * cpad) * isz
                           + cpad * 4 + npad * cpad * 4),
    )(adjp, s2, b2p)

    return out[:n, :nclass]


def gcn_forward(x, adj, params, dropout_rate=0.0, *, compute_dtype=jnp.bfloat16):
    """GCN inference forward. x: [N, nfeat]; adj: [N, N] (or pre-padded via
    prepare_adj(adj, compute_dtype)) -> [N, nclass]."""
    del dropout_rate  # eval-mode dropout is the identity
    w1, b1, w2, b2 = params
    return _gcn_forward_impl(x, adj, w1, b1, w2, b2, compute_dtype=compute_dtype)


# ----------------------------------------------------------------------------
# params / reference
# ----------------------------------------------------------------------------
def init_params(key, nfeat, nhid, nclass):
    """Uniform init matching GraphConvolution.reset_parameters
    (uniform(-1/sqrt(fan_out), 1/sqrt(fan_out)) for weight and bias)."""
    k1, k2, k3, k4 = jax.random.split(key, 4)
    s1 = 1.0 / jnp.sqrt(nhid)
    s2 = 1.0 / jnp.sqrt(nclass)
    w1 = jax.random.uniform(k1, (nfeat, nhid), jnp.float32, -s1, s1)
    b1 = jax.random.uniform(k2, (nhid,), jnp.float32, -s1, s1)
    w2 = jax.random.uniform(k3, (nhid, nclass), jnp.float32, -s2, s2)
    b2 = jax.random.uniform(k4, (nclass,), jnp.float32, -s2, s2)
    return w1, b1, w2, b2


def reference_forward(x, adj, params):
    """Pure-JAX reference for correctness checking."""
    w1, b1, w2, b2 = params
    h = jnp.maximum(adj @ (x @ w1) + b1, 0.0)
    return adj @ (h @ w2) + b2


if __name__ == "__main__":
    # Small synthetic graph: N nodes, nfeat inputs, nhid hidden, nclass outputs.
    N, NFEAT, NHID, NCLASS = 16, 32, 32, 8
    DROPOUT = 0.5

    key = jax.random.PRNGKey(0)
    kx, kadj, kp = jax.random.split(key, 3)

    x = jax.random.normal(kx, (N, NFEAT), jnp.float32)

    # Symmetric, row-normalized adjacency with self-loops (typical GCN input).
    a = (jax.random.uniform(kadj, (N, N)) < 0.3).astype(jnp.float32)
    a = jnp.maximum(a, a.T) + jnp.eye(N, dtype=jnp.float32)
    adj = a / jnp.sum(a, axis=1, keepdims=True)

    params = init_params(kp, NFEAT, NHID, NCLASS)
    ref = reference_forward(x, adj, params)

    # f32 compute path: matches the reference exactly (zero padding is exact).
    out_f32 = jax.block_until_ready(
        gcn_forward(x, adj, params, DROPOUT, compute_dtype=jnp.float32))
    assert out_f32.shape == (N, NCLASS)
    assert jnp.allclose(out_f32, ref, atol=1e-4, rtol=1e-4), "f32 mismatch vs reference"

    # Default bf16 path (halves adj HBM/VMEM traffic, f32 MXU accumulation),
    # with the N^2 pad/cast hoisted out of the per-call path via prepare_adj.
    adj_prepped = jax.block_until_ready(prepare_adj(adj))
    out_bf16 = jax.block_until_ready(gcn_forward(x, adj_prepped, params, DROPOUT))
    assert out_bf16.shape == (N, NCLASS)
    assert jnp.allclose(out_bf16, ref, atol=1e-1, rtol=1e-1), "bf16 mismatch vs reference"

    print("KERNEL_OK")
</pallas_src>

<mosaic_0001>
module attributes {stable_mosaic.version = 11 : i64} {
  func.func @_xw_kernel(%arg0: i32, %arg1: memref<128x128xf32, #tpu.memory_space<vmem>>, %arg2: memref<128x128xf32, #tpu.memory_space<vmem>>, %arg3: memref<128x128xf32, #tpu.memory_space<vmem>>) attributes {dimension_semantics = [#tpu.dimension_semantics<parallel>], iteration_bounds = array<i64: 1>, scalar_prefetch = 0 : i64, scratch_operands = 0 : i64, tpu.core_type = #tpu.core_type<tc>, window_params = [{transform_indices = @transform_0, window_bounds = array<i64: 128, 128>}, {pipeline_mode = #tpu.pipeline_mode<synchronous>, transform_indices = @transform_1, window_bounds = array<i64: 128, 128>}, {transform_indices = @transform_2, window_bounds = array<i64: 128, 128>}]} {
    %c0 = arith.constant 0 : index
    %c0_0 = arith.constant 0 : index
    %0 = vector.load %arg1[%c0, %c0_0] : memref<128x128xf32, #tpu.memory_space<vmem>>, vector<128x128xf32>
    %c0_1 = arith.constant 0 : index
    %c0_2 = arith.constant 0 : index
    %1 = vector.load %arg2[%c0_1, %c0_2] : memref<128x128xf32, #tpu.memory_space<vmem>>, vector<128x128xf32>
    %cst = arith.constant dense<0.000000e+00> : vector<128x128xf32>
    %2 = tpu.matmul %0, %1, %cst {dimension_numbers = #tpu.dot_dimension_numbers<[1], [0], [0], [1], [0, 0, 1, 1], [], []>} : vector<128x128xf32>, vector<128x128xf32>, vector<128x128xf32> -> vector<128x128xf32>
    %c0_3 = arith.constant 0 : index
    %c0_4 = arith.constant 0 : index
    %3 = vector.load %arg3[%c0_3, %c0_4] : memref<128x128xf32, #tpu.memory_space<vmem>>, vector<128x128xf32>
    tpu.vector_store %arg3[%c0_3, %c0_4], %2 {strides = array<i32>} : memref<128x128xf32, #tpu.memory_space<vmem>>, vector<128x128xf32>,
    return
  }
  func.func @transform_0(%arg0: i32) -> (i32, i32) {
    %c0_i32 = arith.constant 0 : i32
    %c0_i32_0 = arith.constant 0 : i32
    return %arg0, %c0_i32 : i32, i32
  }
  func.func @transform_1(%arg0: i32) -> (i32, i32) {
    %c0_i32 = arith.constant 0 : i32
    %c0_i32_0 = arith.constant 0 : i32
    %c0_i32_1 = arith.constant 0 : i32
    return %c0_i32, %c0_i32_0 : i32, i32
  }
  func.func @transform_2(%arg0: i32) -> (i32, i32) {
    %c0_i32 = arith.constant 0 : i32
    %c0_i32_0 = arith.constant 0 : i32
    return %arg0, %c0_i32 : i32, i32
  }
}

module attributes {stable_mosaic.version = 11 : i64} {
  func.func @_gc2_kernel(%arg0: i32, %arg1: memref<128x128xf32, #tpu.memory_space<vmem>>, %arg2: memref<128x128xf32, #tpu.memory_space<vmem>>, %arg3: memref<1x128xf32, #tpu.memory_space<vmem>>, %arg4: memref<128x128xf32, #tpu.memory_space<vmem>>) attributes {dimension_semantics = [#tpu.dimension_semantics<parallel>], iteration_bounds = array<i64: 1>, scalar_prefetch = 0 : i64, scratch_operands = 0 : i64, tpu.core_type = #tpu.core_type<tc>, window_params = [{transform_indices = @transform_0, window_bounds = array<i64: 128, 128>}, {pipeline_mode = #tpu.pipeline_mode<synchronous>, transform_indices = @transform_1, window_bounds = array<i64: 128, 128>}, {pipeline_mode = #tpu.pipeline_mode<synchronous>, transform_indices = @transform_2, window_bounds = array<i64: 1, 128>}, {transform_indices = @transform_3, window_bounds = array<i64: 128, 128>}]} {
    %c0 = arith.constant 0 : index
    %c0_0 = arith.constant 0 : index
    %0 = vector.load %arg1[%c0, %c0_0] : memref<128x128xf32, #tpu.memory_space<vmem>>, vector<128x128xf32>
    %c0_1 = arith.constant 0 : index
    %c0_2 = arith.constant 0 : index
    %1 = vector.load %arg2[%c0_1, %c0_2] : memref<128x128xf32, #tpu.memory_space<vmem>>, vector<128x128xf32>
    %cst = arith.constant dense<0.000000e+00> : vector<128x128xf32>
    %2 = tpu.matmul %0, %1, %cst {dimension_numbers = #tpu.dot_dimension_numbers<[1], [0], [0], [1], [0, 0, 1, 1], [], []>} : vector<128x128xf32>, vector<128x128xf32>, vector<128x128xf32> -> vector<128x128xf32>
    %c0_3 = arith.constant 0 : index
    %c0_4 = arith.constant 0 : index
    %3 = vector.load %arg3[%c0_3, %c0_4] : memref<1x128xf32, #tpu.memory_space<vmem>>, vector<1x128xf32>
    %4 = vector.broadcast %3 : vector<1x128xf32> to vector<128x128xf32>
    %5 = arith.addf %2, %4 : vector<128x128xf32>
    %c0_5 = arith.constant 0 : index
    %c0_6 = arith.constant 0 : index
    %6 = vector.load %arg4[%c0_5, %c0_6] : memref<128x128xf32, #tpu.memory_space<vmem>>, vector<128x128xf32>
    tpu.vector_store %arg4[%c0_5, %c0_6], %5 {strides = array<i32>} : memref<128x128xf32, #tpu.memory_space<vmem>>, vector<128x128xf32>,
    return
  }
  func.func @transform_0(%arg0: i32) -> (i32, i32) {
    %c0_i32 = arith.constant 0 : i32
    %c0_i32_0 = arith.constant 0 : i32
    return %arg0, %c0_i32 : i32, i32
  }
  func.func @transform_1(%arg0: i32) -> (i32, i32) {
    %c0_i32 = arith.constant 0 : i32
    %c0_i32_0 = arith.constant 0 : i32
    %c0_i32_1 = arith.constant 0 : i32
    return %c0_i32, %c0_i32_0 : i32, i32
  }
  func.func @transform_2(%arg0: i32) -> (i32, i32) {
    %c0_i32 = arith.constant 0 : i32
    %c0_i32_0 = arith.constant 0 : i32
    %c0_i32_1 = arith.constant 0 : i32
    return %c0_i32, %c0_i32_0 : i32, i32
  }
  func.func @transform_3(%arg0: i32) -> (i32, i32) {
    %c0_i32 = arith.constant 0 : i32
    %c0_i32_0 = arith.constant 0 : i32
    return %arg0, %c0_i32 : i32, i32
  }
}

module attributes {stable_mosaic.version = 11 : i64} {
  func.func @_gc1_kernel(%arg0: i32, %arg1: memref<128x128xf32, #tpu.memory_space<vmem>>, %arg2: memref<128x128xf32, #tpu.memory_space<vmem>>, %arg3: memref<128x128xf32, #tpu.memory_space<vmem>>, %arg4: memref<1x128xf32, #tpu.memory_space<vmem>>, %arg5: memref<128x128xf32, #tpu.memory_space<vmem>>) attributes {dimension_semantics = [#tpu.dimension_semantics<parallel>], iteration_bounds = array<i64: 1>, scalar_prefetch = 0 : i64, scratch_operands = 0 : i64, tpu.core_type = #tpu.core_type<tc>, window_params = [{transform_indices = @transform_0, window_bounds = array<i64: 128, 128>}, {pipeline_mode = #tpu.pipeline_mode<synchronous>, transform_indices = @transform_1, window_bounds = array<i64: 128, 128>}, {pipeline_mode = #tpu.pipeline_mode<synchronous>, transform_indices = @transform_2, window_bounds = array<i64: 128, 128>}, {pipeline_mode = #tpu.pipeline_mode<synchronous>, transform_indices = @transform_3, window_bounds = array<i64: 1, 128>}, {transform_indices = @transform_4, window_bounds = array<i64: 128, 128>}]} {
    %c0 = arith.constant 0 : index
    %c0_0 = arith.constant 0 : index
    %0 = vector.load %arg1[%c0, %c0_0] : memref<128x128xf32, #tpu.memory_space<vmem>>, vector<128x128xf32>
    %c0_1 = arith.constant 0 : index
    %c0_2 = arith.constant 0 : index
    %1 = vector.load %arg2[%c0_1, %c0_2] : memref<128x128xf32, #tpu.memory_space<vmem>>, vector<128x128xf32>
    %cst = arith.constant dense<0.000000e+00> : vector<128x128xf32>
    %2 = tpu.matmul %0, %1, %cst {dimension_numbers = #tpu.dot_dimension_numbers<[1], [0], [0], [1], [0, 0, 1, 1], [], []>} : vector<128x128xf32>, vector<128x128xf32>, vector<128x128xf32> -> vector<128x128xf32>
    %c0_3 = arith.constant 0 : index
    %c0_4 = arith.constant 0 : index
    %3 = vector.load %arg4[%c0_3, %c0_4] : memref<1x128xf32, #tpu.memory_space<vmem>>, vector<1x128xf32>
    %4 = vector.broadcast %3 : vector<1x128xf32> to vector<128x128xf32>
    %5 = arith.addf %2, %4 : vector<128x128xf32>
    %cst_5 = arith.constant 0.000000e+00 : f32
    %6 = vector.broadcast %cst_5 : f32 to vector<128x128xf32>
    %7 = arith.maximumf %5, %6 : vector<128x128xf32>
    %c0_6 = arith.constant 0 : index
    %c0_7 = arith.constant 0 : index
    %8 = vector.load %arg3[%c0_6, %c0_7] : memref<128x128xf32, #tpu.memory_space<vmem>>, vector<128x128xf32>
    %cst_8 = arith.constant dense<0.000000e+00> : vector<128x128xf32>
    %9 = tpu.matmul %7, %8, %cst_8 {dimension_numbers = #tpu.dot_dimension_numbers<[1], [0], [0], [1], [0, 0, 1, 1], [], []>} : vector<128x128xf32>, vector<128x128xf32>, vector<128x128xf32> -> vector<128x128xf32>
    %c0_9 = arith.constant 0 : index
    %c0_10 = arith.constant 0 : index
    %10 = vector.load %arg5[%c0_9, %c0_10] : memref<128x128xf32, #tpu.memory_space<vmem>>, vector<128x128xf32>
    tpu.vector_store %arg5[%c0_9, %c0_10], %9 {strides = array<i32>} : memref<128x128xf32, #tpu.memory_space<vmem>>, vector<128x128xf32>,
    return
  }
  func.func @transform_0(%arg0: i32) -> (i32, i32) {
    %c0_i32 = arith.constant 0 : i32
    %c0_i32_0 = arith.constant 0 : i32
    return %arg0, %c0_i32 : i32, i32
  }
  func.func @transform_1(%arg0: i32) -> (i32, i32) {
    %c0_i32 = arith.constant 0 : i32
    %c0_i32_0 = arith.constant 0 : i32
    %c0_i32_1 = arith.constant 0 : i32
    return %c0_i32, %c0_i32_0 : i32, i32
  }
  func.func @transform_2(%arg0: i32) -> (i32, i32) {
    %c0_i32 = arith.constant 0 : i32
    %c0_i32_0 = arith.constant 0 : i32
    %c0_i32_1 = arith.constant 0 : i32
    return %c0_i32, %c0_i32_0 : i32, i32
  }
  func.func @transform_3(%arg0: i32) -> (i32, i32) {
    %c0_i32 = arith.constant 0 : i32
    %c0_i32_0 = arith.constant 0 : i32
    %c0_i32_1 = arith.constant 0 : i32
    return %c0_i32, %c0_i32_0 : i32, i32
  }
  func.func @transform_4(%arg0: i32) -> (i32, i32) {
    %c0_i32 = arith.constant 0 : i32
    %c0_i32_0 = arith.constant 0 : i32
    return %arg0, %c0_i32 : i32, i32
  }
}

</mosaic_0001>

<bundles_post_ra>
// kernel: _gcn_forward_impl.3
= control target key start
LH: loop header
LB: loop body
LE: loop exit
PB: predicated region body
PF: predicated region fallthrough
CT: control target
= control target key end

     0   :  { %s335_s1 = inlined_call_operand.vmem [shape: f32[128,128], index: 1, kind: input, shape index: {}]   ;;  %s336_s0 = inlined_call_operand.vmem [shape: f32[128,128], index: 0, kind: input, shape index: {}]   ;;  %s337_s2 = inlined_call_operand.vmem [shape: f32[128,128], index: 2, kind: output, shape index: {}]  }
   0x1   :  { %v42_v0 = vld [vmem:[%s335_s1 + $0x78] sm:$0xff]  ;;  %v41_v1 = vld [vmem:[%s335_s1 + $0x70] sm:$0xff]  ;;  %v40_v2 = vld [vmem:[%s335_s1 + $0x68] sm:$0xff] }
   0x2   :  { %129 = vmatpush.msra.mxu2 %v42_v0  ;;  %130 = vmatpush.msra.mxu3 %v42_v0  ;;  %v39_v3 = vld [vmem:[%s335_s1 + $0x60] sm:$0xff]  ;;  %v38_v4 = vld [vmem:[%s335_s1 + $0x58] sm:$0xff]  ;;  %v37_v5 = vld [vmem:[%s335_s1 + $0x50] sm:$0xff] }
   0x3   :  { %43 = vmatpush.msra.mxu0 %v42_v0  ;;  %128 = vmatpush.msra.mxu1 %v42_v0  ;;  %v36_v6 = vld [vmem:[%s335_s1 + $0x48] sm:$0xff]  ;;  %v35_v7 = vld [vmem:[%s335_s1 + $0x40] sm:$0xff]  ;;  %v34_v8 = vld [vmem:[%s335_s1 + $0x38] sm:$0xff] }
   0x4   :  { %132 = vmatpush.msra.mxu2 %v41_v1  ;;  %133 = vmatpush.msra.mxu3 %v41_v1  ;;  %v33_v9 = vld [vmem:[%s335_s1 + $0x30] sm:$0xff]  ;;  %v32_v10 = vld [vmem:[%s335_s1 + $0x28] sm:$0xff]  ;;  %v31_v11 = vld [vmem:[%s335_s1 + $0x20] sm:$0xff] }
   0x5   :  { %44 = vmatpush.msra.mxu0 %v41_v1  ;;  %131 = vmatpush.msra.mxu1 %v41_v1  ;;  %v30_v12 = vld [vmem:[%s335_s1 + $0x18] sm:$0xff]  ;;  %v29_v13 = vld [vmem:[%s335_s1 + $0x10] sm:$0xff]  ;;  %v28_v14 = vld [vmem:[%s335_s1 + $0x8] sm:$0xff] }
   0x6   :  { %135 = vmatpush.msra.mxu2 %v40_v2  ;;  %136 = vmatpush.msra.mxu3 %v40_v2  ;;  %v27_v15 = vld [vmem:[%s335_s1] sm:$0xff]  ;;  %v20_v20 = vld [vmem:[%s336_s0 + $0x48] sm:$0xff]  ;;  %v21_v24 = vld [vmem:[%s336_s0 + $0x50] sm:$0xff] }
   0x7   :  { %45 = vmatpush.msra.mxu0 %v40_v2  ;;  %134 = vmatpush.msra.mxu1 %v40_v2  ;;  %v19_v16 = vld [vmem:[%s336_s0 + $0x40] sm:$0xff]  ;;  %v24_v21 = vld [vmem:[%s336_s0 + $0x68] sm:$0xff]  ;;  %v25_v25 = vld [vmem:[%s336_s0 + $0x70] sm:$0xff] }
   0x8   :  { %138 = vmatpush.msra.mxu2 %v39_v3  ;;  %139 = vmatpush.msra.mxu3 %v39_v3  ;;  %v23_v17 = vld [vmem:[%s336_s0 + $0x60] sm:$0xff]  ;;  %v12_v22 = vld [vmem:[%s336_s0 + $0x8] sm:$0xff]  ;;  %v13_v26 = vld [vmem:[%s336_s0 + $0x10] sm:$0xff] }
   0x9   :  { %46 = vmatpush.msra.mxu0 %v39_v3  ;;  %137 = vmatpush.msra.mxu1 %v39_v3  ;;  %v11_v18 = vld [vmem:[%s336_s0] sm:$0xff]  ;;  %v16_v23 = vld [vmem:[%s336_s0 + $0x28] sm:$0xff]  ;;  %v17_v27 = vld [vmem:[%s336_s0 + $0x30] sm:$0xff] }
   0xa   :  { %141 = vmatpush.msra.mxu2 %v38_v4  ;;  %142 = vmatpush.msra.mxu3 %v38_v4  ;;  %v15_v19 = vld [vmem:[%s336_s0 + $0x20] sm:$0xff]  ;;  %v22_v28 = vld [vmem:[%s336_s0 + $0x58] sm:$0xff] }
   0xb   :  { %47 = vmatpush.msra.mxu0 %v38_v4  ;;  %140 = vmatpush.msra.mxu1 %v38_v4  ;;  %v26_v29 = vld [vmem:[%s336_s0 + $0x78] sm:$0xff] }
   0xc   :  { %144 = vmatpush.msra.mxu2 %v37_v5  ;;  %145 = vmatpush.msra.mxu3 %v37_v5  ;;  %v14_v30 = vld [vmem:[%s336_s0 + $0x18] sm:$0xff] }
   0xd   :  { %48 = vmatpush.msra.mxu0 %v37_v5  ;;  %143 = vmatpush.msra.mxu1 %v37_v5  ;;  %v18_v31 = vld [vmem:[%s336_s0 + $0x38] sm:$0xff] }
   0xe   :  { %147 = vmatpush.msra.mxu2 %v36_v6  ;;  %148 = vmatpush.msra.mxu3 %v36_v6 }
   0xf   :  { %49 = vmatpush.msra.mxu0 %v36_v6  ;;  %146 = vmatpush.msra.mxu1 %v36_v6 }
  0x10   :  { %150 = vmatpush.msra.mxu2 %v35_v7  ;;  %151 = vmatpush.msra.mxu3 %v35_v7 }
  0x11   :  { %50 = vmatpush.msra.mxu0 %v35_v7  ;;  %149 = vmatpush.msra.mxu1 %v35_v7 }
  0x12   :  { %153 = vmatpush.msra.mxu2 %v34_v8  ;;  %154 = vmatpush.msra.mxu3 %v34_v8 }
  0x13   :  { %51 = vmatpush.msra.mxu0 %v34_v8  ;;  %152 = vmatpush.msra.mxu1 %v34_v8 }
  0x14   :  { %156 = vmatpush.msra.mxu2 %v33_v9  ;;  %157 = vmatpush.msra.mxu3 %v33_v9 }
  0x15   :  { %52 = vmatpush.msra.mxu0 %v33_v9  ;;  %155 = vmatpush.msra.mxu1 %v33_v9 }
  0x16   :  { %159 = vmatpush.msra.mxu2 %v32_v10  ;;  %160 = vmatpush.msra.mxu3 %v32_v10 }
  0x17   :  { %53 = vmatpush.msra.mxu0 %v32_v10  ;;  %158 = vmatpush.msra.mxu1 %v32_v10 }
  0x18   :  { %162 = vmatpush.msra.mxu2 %v31_v11  ;;  %163 = vmatpush.msra.mxu3 %v31_v11 }
  0x19   :  { %54 = vmatpush.msra.mxu0 %v31_v11  ;;  %161 = vmatpush.msra.mxu1 %v31_v11 }
  0x1a   :  { %165 = vmatpush.msra.mxu2 %v30_v12  ;;  %166 = vmatpush.msra.mxu3 %v30_v12 }
  0x1b   :  { %55 = vmatpush.msra.mxu0 %v30_v12  ;;  %164 = vmatpush.msra.mxu1 %v30_v12 }
  0x1c   :  { %168 = vmatpush.msra.mxu2 %v29_v13  ;;  %169 = vmatpush.msra.mxu3 %v29_v13 }
  0x1d   :  { %56 = vmatpush.msra.mxu0 %v29_v13  ;;  %167 = vmatpush.msra.mxu1 %v29_v13 }
  0x1e   :  { %171 = vmatpush.msra.mxu2 %v28_v14  ;;  %172 = vmatpush.msra.mxu3 %v28_v14 }
  0x1f   :  { %57 = vmatpush.msra.mxu0 %v28_v14  ;;  %170 = vmatpush.msra.mxu1 %v28_v14 }
  0x20   :  { %174 = vmatpush.msra.mxu2 %v27_v15  ;;  %175 = vmatpush.msra.mxu3 %v27_v15 }
  0x21   :  { %83 = vmatmul.f32.vlgmr.msra.gmra.mxu2 %v19_v16  ;;  %95 = vmatmul.f32.vlgmr.msra.gmra.mxu3 %v23_v17 }
  0x22   :  { %58 = vmatpush.msra.mxu0 %v27_v15  ;;  %173 = vmatpush.msra.mxu1 %v27_v15 }
  0x23   :  { %59 = vmatmul.f32.vlgmr.msra.gmra.mxu0 %v11_v18  ;;  %71 = vmatmul.f32.vlgmr.msra.gmra.mxu1 %v15_v19 }
  0x29   :  { %86 = vmatmul.f32.gmra.mxu2 %v20_v20  ;;  %98 = vmatmul.f32.gmra.mxu3 %v24_v21 }
  0x2b   :  { %62 = vmatmul.f32.gmra.mxu0 %v12_v22  ;;  %74 = vmatmul.f32.gmra.mxu1 %v16_v23 }
  0x31   :  { %89 = vmatmul.f32.gmra.mxu2 %v21_v24  ;;  %101 = vmatmul.f32.gmra.mxu3 %v25_v25 }
  0x33   :  { %65 = vmatmul.f32.gmra.mxu0 %v13_v26  ;;  %77 = vmatmul.f32.gmra.mxu1 %v17_v27 }
  0x39   :  { %92 = vmatmul.f32.gmra.mxu2 %v22_v28  ;;  %104 = vmatmul.f32.gmra.mxu3 %v26_v29 }
  0x3b   :  { %68 = vmatmul.f32.gmra.mxu0 %v14_v30  ;;  %80 = vmatmul.f32.gmra.mxu1 %v18_v31 }
  0xa0   :  { %v60_v32 = vpop.f32.mrf.mxu0  ;;  %v72_v33 = vpop.f32.mrf.mxu1 }
  0xa1   :  { %108 = vst [vmem:[%s337_s2] sm:$0xff] %v60_v32 }
  0xa2   :  { %112 = vst [vmem:[%s337_s2 + $0x20] sm:$0xff] %v72_v33 }
  0xa4   :  { %v84_v34 = vpop.f32.mrf.mxu2  ;;  %v96_v35 = vpop.f32.mrf.mxu3 }
  0xa5   :  { %116 = vst [vmem:[%s337_s2 + $0x40] sm:$0xff] %v84_v34 }
  0xa6   :  { %120 = vst [vmem:[%s337_s2 + $0x60] sm:$0xff] %v96_v35 }
  0xa8   :  { %v63_v36 = vpop.f32.mrf.mxu0  ;;  %v75_v37 = vpop.f32.mrf.mxu1 }
  0xa9   :  { %109 = vst [vmem:[%s337_s2 + $0x8] sm:$0xff] %v63_v36 }
  0xaa   :  { %113 = vst [vmem:[%s337_s2 + $0x28] sm:$0xff] %v75_v37 }
  0xac   :  { %v87_v38 = vpop.f32.mrf.mxu2  ;;  %v99_v39 = vpop.f32.mrf.mxu3 }
  0xad   :  { %117 = vst [vmem:[%s337_s2 + $0x48] sm:$0xff] %v87_v38 }
  0xae   :  { %121 = vst [vmem:[%s337_s2 + $0x68] sm:$0xff] %v99_v39 }
  0xb0   :  { %v66_v40 = vpop.f32.mrf.mxu0  ;;  %v78_v41 = vpop.f32.mrf.mxu1 }
  0xb1   :  { %110 = vst [vmem:[%s337_s2 + $0x10] sm:$0xff] %v66_v40 }
  0xb2   :  { %114 = vst [vmem:[%s337_s2 + $0x30] sm:$0xff] %v78_v41 }
  0xb4   :  { %v90_v42 = vpop.f32.mrf.mxu2  ;;  %v102_v43 = vpop.f32.mrf.mxu3 }
  0xb5   :  { %118 = vst [vmem:[%s337_s2 + $0x50] sm:$0xff] %v90_v42 }
  0xb6   :  { %122 = vst [vmem:[%s337_s2 + $0x70] sm:$0xff] %v102_v43 }
  0xb8   :  { %v69_v44 = vpop.f32.mrf.mxu0  ;;  %v81_v45 = vpop.f32.mrf.mxu1 }
  0xb9   :  { %111 = vst [vmem:[%s337_s2 + $0x18] sm:$0xff] %v69_v44 }
  0xba   :  { %115 = vst [vmem:[%s337_s2 + $0x38] sm:$0xff] %v81_v45 }
  0xbc   :  { %v93_v46 = vpop.f32.mrf.mxu2  ;;  %v105_v47 = vpop.f32.mrf.mxu3 }
  0xbd   :  { %119 = vst [vmem:[%s337_s2 + $0x58] sm:$0xff] %v93_v46 }
  0xbe   :  { %123 = vst [vmem:[%s337_s2 + $0x78] sm:$0xff] %v105_v47 }

// kernel: _gcn_forward_impl.5
= control target key start
LH: loop header
LB: loop body
LE: loop exit
PB: predicated region body
PF: predicated region fallthrough
CT: control target
= control target key end

     0   :  { %s351_s1 = inlined_call_operand.vmem [shape: f32[128,128], index: 1, kind: input, shape index: {}]   ;;  %s352_s2 = inlined_call_operand.vmem [shape: f32[1,128], index: 2, kind: input, shape index: {}]   ;;  %s353_s0 = inlined_call_operand.vmem [shape: f32[128,128], index: 0, kind: input, shape index: {}]   ;;  %s354_s3 = inlined_call_operand.vmem [shape: f32[128,128], index: 3, kind: output, shape index: {}]  }
   0x1   :  { %v45_v0 = vld [vmem:[%s351_s1 + $0x78] sm:$0xff]  ;;  %v44_v1 = vld [vmem:[%s351_s1 + $0x70] sm:$0xff]  ;;  %v43_v2 = vld [vmem:[%s351_s1 + $0x68] sm:$0xff] }
   0x2   :  { %136 = vmatpush.msra.mxu2 %v45_v0  ;;  %137 = vmatpush.msra.mxu3 %v45_v0  ;;  %v42_v3 = vld [vmem:[%s351_s1 + $0x60] sm:$0xff]  ;;  %v41_v4 = vld [vmem:[%s351_s1 + $0x58] sm:$0xff]  ;;  %v40_v5 = vld [vmem:[%s351_s1 + $0x50] sm:$0xff] }
   0x3   :  { %50 = vmatpush.msra.mxu0 %v45_v0  ;;  %135 = vmatpush.msra.mxu1 %v45_v0  ;;  %v39_v6 = vld [vmem:[%s351_s1 + $0x48] sm:$0xff]  ;;  %v38_v7 = vld [vmem:[%s351_s1 + $0x40] sm:$0xff]  ;;  %v37_v8 = vld [vmem:[%s351_s1 + $0x38] sm:$0xff] }
   0x4   :  { %139 = vmatpush.msra.mxu2 %v44_v1  ;;  %140 = vmatpush.msra.mxu3 %v44_v1  ;;  %v36_v9 = vld [vmem:[%s351_s1 + $0x30] sm:$0xff]  ;;  %v35_v10 = vld [vmem:[%s351_s1 + $0x28] sm:$0xff]  ;;  %v34_v11 = vld [vmem:[%s351_s1 + $0x20] sm:$0xff] }
   0x5   :  { %51 = vmatpush.msra.mxu0 %v44_v1  ;;  %138 = vmatpush.msra.mxu1 %v44_v1  ;;  %v33_v12 = vld [vmem:[%s351_s1 + $0x18] sm:$0xff]  ;;  %v32_v13 = vld [vmem:[%s351_s1 + $0x10] sm:$0xff]  ;;  %v31_v14 = vld [vmem:[%s351_s1 + $0x8] sm:$0xff] }
   0x6   :  { %142 = vmatpush.msra.mxu2 %v43_v2  ;;  %143 = vmatpush.msra.mxu3 %v43_v2  ;;  %v30_v15 = vld [vmem:[%s351_s1] sm:$0xff]  ;;  %v23_v20 = vld [vmem:[%s353_s0 + $0x48] sm:$0xff]  ;;  %v24_v24 = vld [vmem:[%s353_s0 + $0x50] sm:$0xff] }
   0x7   :  { %52 = vmatpush.msra.mxu0 %v43_v2  ;;  %141 = vmatpush.msra.mxu1 %v43_v2  ;;  %v22_v16 = vld [vmem:[%s353_s0 + $0x40] sm:$0xff]  ;;  %v27_v21 = vld [vmem:[%s353_s0 + $0x68] sm:$0xff]  ;;  %v28_v25 = vld [vmem:[%s353_s0 + $0x70] sm:$0xff] }
   0x8   :  { %145 = vmatpush.msra.mxu2 %v42_v3  ;;  %146 = vmatpush.msra.mxu3 %v42_v3  ;;  %v26_v17 = vld [vmem:[%s353_s0 + $0x60] sm:$0xff]  ;;  %v15_v22 = vld [vmem:[%s353_s0 + $0x8] sm:$0xff]  ;;  %v16_v26 = vld [vmem:[%s353_s0 + $0x10] sm:$0xff] }
   0x9   :  { %53 = vmatpush.msra.mxu0 %v42_v3  ;;  %144 = vmatpush.msra.mxu1 %v42_v3  ;;  %v14_v18 = vld [vmem:[%s353_s0] sm:$0xff]  ;;  %v19_v23 = vld [vmem:[%s353_s0 + $0x28] sm:$0xff]  ;;  %v20_v27 = vld [vmem:[%s353_s0 + $0x30] sm:$0xff] }
   0xa   :  { %148 = vmatpush.msra.mxu2 %v41_v4  ;;  %149 = vmatpush.msra.mxu3 %v41_v4  ;;  %v18_v19 = vld [vmem:[%s353_s0 + $0x20] sm:$0xff]  ;;  %v25_v28 = vld [vmem:[%s353_s0 + $0x58] sm:$0xff] }
   0xb   :  { %54 = vmatpush.msra.mxu0 %v41_v4  ;;  %147 = vmatpush.msra.mxu1 %v41_v4  ;;  %v29_v29 = vld [vmem:[%s353_s0 + $0x78] sm:$0xff]  ;;  %v183_v32 = vld [vmem:[%s352_s2] ss:$0 sm:$0xff] }
   0xc   :  { %151 = vmatpush.msra.mxu2 %v40_v5  ;;  %152 = vmatpush.msra.mxu3 %v40_v5  ;;  %v17_v30 = vld [vmem:[%s353_s0 + $0x18] sm:$0xff] }
   0xd   :  { %55 = vmatpush.msra.mxu0 %v40_v5  ;;  %150 = vmatpush.msra.mxu1 %v40_v5  ;;  %v21_v31 = vld [vmem:[%s353_s0 + $0x38] sm:$0xff] }
   0xe   :  { %154 = vmatpush.msra.mxu2 %v39_v6  ;;  %155 = vmatpush.msra.mxu3 %v39_v6 }
   0xf   :  { %56 = vmatpush.msra.mxu0 %v39_v6  ;;  %153 = vmatpush.msra.mxu1 %v39_v6 }
  0x10   :  { %157 = vmatpush.msra.mxu2 %v38_v7  ;;  %158 = vmatpush.msra.mxu3 %v38_v7 }
  0x11   :  { %57 = vmatpush.msra.mxu0 %v38_v7  ;;  %156 = vmatpush.msra.mxu1 %v38_v7 }
  0x12   :  { %160 = vmatpush.msra.mxu2 %v37_v8  ;;  %161 = vmatpush.msra.mxu3 %v37_v8 }
  0x13   :  { %58 = vmatpush.msra.mxu0 %v37_v8  ;;  %159 = vmatpush.msra.mxu1 %v37_v8 }
  0x14   :  { %163 = vmatpush.msra.mxu2 %v36_v9  ;;  %164 = vmatpush.msra.mxu3 %v36_v9 }
  0x15   :  { %59 = vmatpush.msra.mxu0 %v36_v9  ;;  %162 = vmatpush.msra.mxu1 %v36_v9 }
  0x16   :  { %166 = vmatpush.msra.mxu2 %v35_v10  ;;  %167 = vmatpush.msra.mxu3 %v35_v10 }
  0x17   :  { %60 = vmatpush.msra.mxu0 %v35_v10  ;;  %165 = vmatpush.msra.mxu1 %v35_v10 }
  0x18   :  { %169 = vmatpush.msra.mxu2 %v34_v11  ;;  %170 = vmatpush.msra.mxu3 %v34_v11 }
  0x19   :  { %61 = vmatpush.msra.mxu0 %v34_v11  ;;  %168 = vmatpush.msra.mxu1 %v34_v11 }
  0x1a   :  { %172 = vmatpush.msra.mxu2 %v33_v12  ;;  %173 = vmatpush.msra.mxu3 %v33_v12 }
  0x1b   :  { %62 = vmatpush.msra.mxu0 %v33_v12  ;;  %171 = vmatpush.msra.mxu1 %v33_v12 }
  0x1c   :  { %175 = vmatpush.msra.mxu2 %v32_v13  ;;  %176 = vmatpush.msra.mxu3 %v32_v13 }
  0x1d   :  { %63 = vmatpush.msra.mxu0 %v32_v13  ;;  %174 = vmatpush.msra.mxu1 %v32_v13 }
  0x1e   :  { %178 = vmatpush.msra.mxu2 %v31_v14  ;;  %179 = vmatpush.msra.mxu3 %v31_v14 }
  0x1f   :  { %64 = vmatpush.msra.mxu0 %v31_v14  ;;  %177 = vmatpush.msra.mxu1 %v31_v14 }
  0x20   :  { %181 = vmatpush.msra.mxu2 %v30_v15  ;;  %182 = vmatpush.msra.mxu3 %v30_v15 }
  0x21   :  { %90 = vmatmul.f32.vlgmr.msra.gmra.mxu2 %v22_v16  ;;  %102 = vmatmul.f32.vlgmr.msra.gmra.mxu3 %v26_v17 }
  0x22   :  { %65 = vmatpush.msra.mxu0 %v30_v15  ;;  %180 = vmatpush.msra.mxu1 %v30_v15 }
  0x23   :  { %66 = vmatmul.f32.vlgmr.msra.gmra.mxu0 %v14_v18  ;;  %78 = vmatmul.f32.vlgmr.msra.gmra.mxu1 %v18_v19 }
  0x29   :  { %93 = vmatmul.f32.gmra.mxu2 %v23_v20  ;;  %105 = vmatmul.f32.gmra.mxu3 %v27_v21 }
  0x2b   :  { %69 = vmatmul.f32.gmra.mxu0 %v15_v22  ;;  %81 = vmatmul.f32.gmra.mxu1 %v19_v23 }
  0x31   :  { %96 = vmatmul.f32.gmra.mxu2 %v24_v24  ;;  %108 = vmatmul.f32.gmra.mxu3 %v28_v25 }
  0x33   :  { %72 = vmatmul.f32.gmra.mxu0 %v16_v26  ;;  %84 = vmatmul.f32.gmra.mxu1 %v20_v27 }
  0x39   :  { %99 = vmatmul.f32.gmra.mxu2 %v25_v28  ;;  %111 = vmatmul.f32.gmra.mxu3 %v29_v29 }
  0x3b   :  { %75 = vmatmul.f32.gmra.mxu0 %v17_v30  ;;  %87 = vmatmul.f32.gmra.mxu1 %v21_v31 }
  0xa0   :  { %v67_v33 = vpop.f32.mrf.mxu0  ;;  %v79_v34 = vpop.f32.mrf.mxu1 }
  0xa1   :  { %v68_v35 = vadd.f32 %v183_v32, %v67_v33  ;;  %v80_v36 = vadd.f32 %v183_v32, %v79_v34 }
  0xa3   :  { %115 = vst [vmem:[%s354_s3] sm:$0xff] %v68_v35 }
  0xa4   :  { %119 = vst [vmem:[%s354_s3 + $0x20] sm:$0xff] %v80_v36  ;;  %v91_v37 = vpop.f32.mrf.mxu2  ;;  %v103_v38 = vpop.f32.mrf.mxu3 }
  0xa5   :  { %v92_v39 = vadd.f32 %v183_v32, %v91_v37  ;;  %v104_v40 = vadd.f32 %v183_v32, %v103_v38 }
  0xa7   :  { %123 = vst [vmem:[%s354_s3 + $0x40] sm:$0xff] %v92_v39 }
  0xa8   :  { %127 = vst [vmem:[%s354_s3 + $0x60] sm:$0xff] %v104_v40  ;;  %v70_v41 = vpop.f32.mrf.mxu0  ;;  %v82_v42 = vpop.f32.mrf.mxu1 }
  0xa9   :  { %v71_v43 = vadd.f32 %v183_v32, %v70_v41  ;;  %v83_v44 = vadd.f32 %v183_v32, %v82_v42 }
  0xab   :  { %116 = vst [vmem:[%s354_s3 + $0x8] sm:$0xff] %v71_v43 }
  0xac   :  { %120 = vst [vmem:[%s354_s3 + $0x28] sm:$0xff] %v83_v44  ;;  %v94_v45 = vpop.f32.mrf.mxu2  ;;  %v106_v46 = vpop.f32.mrf.mxu3 }
  0xad   :  { %v95_v47 = vadd.f32 %v183_v32, %v94_v45  ;;  %v107_v48 = vadd.f32 %v183_v32, %v106_v46 }
  0xaf   :  { %124 = vst [vmem:[%s354_s3 + $0x48] sm:$0xff] %v95_v47 }
  0xb0   :  { %128 = vst [vmem:[%s354_s3 + $0x68] sm:$0xff] %v107_v48  ;;  %v73_v49 = vpop.f32.mrf.mxu0  ;;  %v85_v50 = vpop.f32.mrf.mxu1 }
  0xb1   :  { %v74_v51 = vadd.f32 %v183_v32, %v73_v49  ;;  %v86_v52 = vadd.f32 %v183_v32, %v85_v50 }
  0xb3   :  { %117 = vst [vmem:[%s354_s3 + $0x10] sm:$0xff] %v74_v51 }
  0xb4   :  { %121 = vst [vmem:[%s354_s3 + $0x30] sm:$0xff] %v86_v52  ;;  %v97_v53 = vpop.f32.mrf.mxu2  ;;  %v109_v54 = vpop.f32.mrf.mxu3 }
  0xb5   :  { %v98_v55 = vadd.f32 %v183_v32, %v97_v53  ;;  %v110_v56 = vadd.f32 %v183_v32, %v109_v54 }
  0xb7   :  { %125 = vst [vmem:[%s354_s3 + $0x50] sm:$0xff] %v98_v55 }
  0xb8   :  { %129 = vst [vmem:[%s354_s3 + $0x70] sm:$0xff] %v110_v56  ;;  %v76_v57 = vpop.f32.mrf.mxu0  ;;  %v88_v58 = vpop.f32.mrf.mxu1 }
  0xb9   :  { %v77_v59 = vadd.f32 %v183_v32, %v76_v57  ;;  %v89_v60 = vadd.f32 %v183_v32, %v88_v58 }
  0xbb   :  { %118 = vst [vmem:[%s354_s3 + $0x18] sm:$0xff] %v77_v59 }
  0xbc   :  { %122 = vst [vmem:[%s354_s3 + $0x38] sm:$0xff] %v89_v60  ;;  %v100_v61 = vpop.f32.mrf.mxu2  ;;  %v112_v62 = vpop.f32.mrf.mxu3 }
  0xbd   :  { %v101_v63 = vadd.f32 %v183_v32, %v100_v61  ;;  %v113_v0 = vadd.f32 %v183_v32, %v112_v62 }
  0xbf   :  { %126 = vst [vmem:[%s354_s3 + $0x58] sm:$0xff] %v101_v63 }
  0xc0   :  { %130 = vst [vmem:[%s354_s3 + $0x78] sm:$0xff] %v113_v0 }

// kernel: _gcn_forward_impl.4
= control target key start
LH: loop header
LB: loop body
LE: loop exit
PB: predicated region body
PF: predicated region fallthrough
CT: control target
= control target key end

     0   :  { %s488_s1 = inlined_call_operand.vmem [shape: f32[128,128], index: 1, kind: input, shape index: {}]   ;;  %s489_s3 = inlined_call_operand.vmem [shape: f32[1,128], index: 3, kind: input, shape index: {}]   ;;  %s490_s0 = inlined_call_operand.vmem [shape: f32[128,128], index: 0, kind: input, shape index: {}]   ;;  %s491_s2 = inlined_call_operand.vmem [shape: f32[128,128], index: 2, kind: input, shape index: {}]   ;;  %s492_s4 = inlined_call_operand.vmem [shape: f32[128,128], index: 4, kind: output, shape index: {}]  }
   0x1   :  { %v48_v0 = vld [vmem:[%s488_s1 + $0x78] sm:$0xff]  ;;  %v47_v1 = vld [vmem:[%s488_s1 + $0x70] sm:$0xff]  ;;  %v46_v2 = vld [vmem:[%s488_s1 + $0x68] sm:$0xff] }
   0x2   :  { %235 = vmatpush.msra.mxu2 %v48_v0  ;;  %53 = vmatpush.msra.mxu0 %v48_v0  ;;  %v45_v3 = vld [vmem:[%s488_s1 + $0x60] sm:$0xff]  ;;  %v44_v4 = vld [vmem:[%s488_s1 + $0x58] sm:$0xff]  ;;  %v43_v5 = vld [vmem:[%s488_s1 + $0x50] sm:$0xff] }
   0x3   :  { %v42_v6 = vld [vmem:[%s488_s1 + $0x48] sm:$0xff]  ;;  %v41_v7 = vld [vmem:[%s488_s1 + $0x40] sm:$0xff]  ;;  %v40_v8 = vld [vmem:[%s488_s1 + $0x38] sm:$0xff] }
   0x4   :  { %236 = vmatpush.msra.mxu2 %v47_v1  ;;  %54 = vmatpush.msra.mxu0 %v47_v1  ;;  %v39_v9 = vld [vmem:[%s488_s1 + $0x30] sm:$0xff]  ;;  %v38_v10 = vld [vmem:[%s488_s1 + $0x28] sm:$0xff]  ;;  %v37_v11 = vld [vmem:[%s488_s1 + $0x20] sm:$0xff] }
   0x5   :  { %v36_v12 = vld [vmem:[%s488_s1 + $0x18] sm:$0xff]  ;;  %v35_v13 = vld [vmem:[%s488_s1 + $0x10] sm:$0xff]  ;;  %v34_v14 = vld [vmem:[%s488_s1 + $0x8] sm:$0xff] }
   0x6   :  { %237 = vmatpush.msra.mxu2 %v46_v2  ;;  %55 = vmatpush.msra.mxu0 %v46_v2  ;;  %v33_v15 = vld [vmem:[%s488_s1] sm:$0xff]  ;;  %v26_v18 = vld [vmem:[%s490_s0 + $0x48] sm:$0xff]  ;;  %v27_v20 = vld [vmem:[%s490_s0 + $0x50] sm:$0xff] }
   0x7   :  { %v25_v16 = vld [vmem:[%s490_s0 + $0x40] sm:$0xff]  ;;  %v18_v19 = vld [vmem:[%s490_s0 + $0x8] sm:$0xff]  ;;  %v19_v21 = vld [vmem:[%s490_s0 + $0x10] sm:$0xff] }
   0x8   :  { %238 = vmatpush.msra.mxu2 %v45_v3  ;;  %56 = vmatpush.msra.mxu0 %v45_v3  ;;  %v17_v17 = vld [vmem:[%s490_s0] sm:$0xff]  ;;  %v28_v22 = vld [vmem:[%s490_s0 + $0x58] sm:$0xff]  ;;  %v148_v25 = vld [vmem:[%s491_s2 + $0x70] sm:$0xff] }
   0x9   :  { %v20_v23 = vld [vmem:[%s490_s0 + $0x18] sm:$0xff]  ;;  %v147_v26 = vld [vmem:[%s491_s2 + $0x68] sm:$0xff]  ;;  %v146_v27 = vld [vmem:[%s491_s2 + $0x60] sm:$0xff] }
   0xa   :  { %239 = vmatpush.msra.mxu2 %v44_v4  ;;  %57 = vmatpush.msra.mxu0 %v44_v4  ;;  %v149_v24 = vld [vmem:[%s491_s2 + $0x78] sm:$0xff]  ;;  %v29_v28 = vld [vmem:[%s490_s0 + $0x60] sm:$0xff]  ;;  %v144_v31 = vld [vmem:[%s491_s2 + $0x50] sm:$0xff] }
   0xb   :  { %251 = vmatpush.msra.mxu3 %v149_v24  ;;  %150 = vmatpush.msra.mxu1 %v149_v24  ;;  %v21_v29 = vld [vmem:[%s490_s0 + $0x20] sm:$0xff]  ;;  %v145_v30 = vld [vmem:[%s491_s2 + $0x58] sm:$0xff]  ;;  %v143_v32 = vld [vmem:[%s491_s2 + $0x48] sm:$0xff] }
   0xc   :  { %240 = vmatpush.msra.mxu2 %v43_v5  ;;  %58 = vmatpush.msra.mxu0 %v43_v5  ;;  %v142_v33 = vld [vmem:[%s491_s2 + $0x40] sm:$0xff]  ;;  %v30_v34 = vld [vmem:[%s490_s0 + $0x68] sm:$0xff]  ;;  %v141_v36 = vld [vmem:[%s491_s2 + $0x38] sm:$0xff] }
   0xd   :  { %252 = vmatpush.msra.mxu3 %v148_v25  ;;  %151 = vmatpush.msra.mxu1 %v148_v25  ;;  %v22_v35 = vld [vmem:[%s490_s0 + $0x28] sm:$0xff]  ;;  %v140_v37 = vld [vmem:[%s491_s2 + $0x30] sm:$0xff]  ;;  %v138_v39 = vld [vmem:[%s491_s2 + $0x20] sm:$0xff] }
   0xe   :  { %241 = vmatpush.msra.mxu2 %v42_v6  ;;  %59 = vmatpush.msra.mxu0 %v42_v6  ;;  %v139_v38 = vld [vmem:[%s491_s2 + $0x28] sm:$0xff]  ;;  %v31_v40 = vld [vmem:[%s490_s0 + $0x70] sm:$0xff]  ;;  %v137_v42 = vld [vmem:[%s491_s2 + $0x18] sm:$0xff] }
   0xf   :  { %253 = vmatpush.msra.mxu3 %v147_v26  ;;  %152 = vmatpush.msra.mxu1 %v147_v26  ;;  %v23_v41 = vld [vmem:[%s490_s0 + $0x30] sm:$0xff]  ;;  %v32_v43 = vld [vmem:[%s490_s0 + $0x78] sm:$0xff]  ;;  %v135_v46 = vld [vmem:[%s491_s2 + $0x8] sm:$0xff] }
  0x10   :  { %242 = vmatpush.msra.mxu2 %v41_v7  ;;  %60 = vmatpush.msra.mxu0 %v41_v7  ;;  %v24_v44 = vld [vmem:[%s490_s0 + $0x38] sm:$0xff]  ;;  %v136_v45 = vld [vmem:[%s491_s2 + $0x10] sm:$0xff]  ;;  %v134_v47 = vld [vmem:[%s491_s2] sm:$0xff] }
  0x11   :  { %254 = vmatpush.msra.mxu3 %v146_v27  ;;  %153 = vmatpush.msra.mxu1 %v146_v27  ;;  %v267_v48 = vld [vmem:[%s489_s3] ss:$0 sm:$0xff] }
  0x12   :  { %243 = vmatpush.msra.mxu2 %v40_v8  ;;  %61 = vmatpush.msra.mxu0 %v40_v8 }
  0x13   :  { %255 = vmatpush.msra.mxu3 %v145_v30  ;;  %154 = vmatpush.msra.mxu1 %v145_v30 }
  0x14   :  { %244 = vmatpush.msra.mxu2 %v39_v9  ;;  %62 = vmatpush.msra.mxu0 %v39_v9 }
  0x15   :  { %256 = vmatpush.msra.mxu3 %v144_v31  ;;  %155 = vmatpush.msra.mxu1 %v144_v31 }
  0x16   :  { %245 = vmatpush.msra.mxu2 %v38_v10  ;;  %63 = vmatpush.msra.mxu0 %v38_v10 }
  0x17   :  { %257 = vmatpush.msra.mxu3 %v143_v32  ;;  %156 = vmatpush.msra.mxu1 %v143_v32 }
  0x18   :  { %246 = vmatpush.msra.mxu2 %v37_v11  ;;  %64 = vmatpush.msra.mxu0 %v37_v11 }
  0x19   :  { %258 = vmatpush.msra.mxu3 %v142_v33  ;;  %157 = vmatpush.msra.mxu1 %v142_v33 }
  0x1a   :  { %247 = vmatpush.msra.mxu2 %v36_v12  ;;  %65 = vmatpush.msra.mxu0 %v36_v12 }
  0x1b   :  { %259 = vmatpush.msra.mxu3 %v141_v36  ;;  %158 = vmatpush.msra.mxu1 %v141_v36 }
  0x1c   :  { %248 = vmatpush.msra.mxu2 %v35_v13  ;;  %66 = vmatpush.msra.mxu0 %v35_v13 }
  0x1d   :  { %260 = vmatpush.msra.mxu3 %v140_v37  ;;  %159 = vmatpush.msra.mxu1 %v140_v37 }
  0x1e   :  { %249 = vmatpush.msra.mxu2 %v34_v14  ;;  %67 = vmatpush.msra.mxu0 %v34_v14 }
  0x1f   :  { %261 = vmatpush.msra.mxu3 %v139_v38  ;;  %160 = vmatpush.msra.mxu1 %v139_v38 }
  0x20   :  { %250 = vmatpush.msra.mxu2 %v33_v15  ;;  %68 = vmatpush.msra.mxu0 %v33_v15 }
  0x21   :  { %93 = vmatmul.f32.vlgmr.msra.gmra.mxu2 %v25_v16  ;;  %69 = vmatmul.f32.vlgmr.msra.gmra.mxu0 %v17_v17 }
  0x22   :  { %262 = vmatpush.msra.mxu3 %v138_v39  ;;  %161 = vmatpush.msra.mxu1 %v138_v39 }
  0x24   :  { %263 = vmatpush.msra.mxu3 %v137_v42  ;;  %162 = vmatpush.msra.mxu1 %v137_v42 }
  0x26   :  { %264 = vmatpush.msra.mxu3 %v136_v45  ;;  %163 = vmatpush.msra.mxu1 %v136_v45 }
  0x28   :  { %265 = vmatpush.msra.mxu3 %v135_v46  ;;  %164 = vmatpush.msra.mxu1 %v135_v46 }
  0x29   :  { %96 = vmatmul.f32.gmra.mxu2 %v26_v18  ;;  %72 = vmatmul.f32.gmra.mxu0 %v18_v19 }
  0x2a   :  { %266 = vmatpush.msra.mxu3 %v134_v47  ;;  %165 = vmatpush.msra.mxu1 %v134_v47 }
  0x31   :  { %99 = vmatmul.f32.gmra.mxu2 %v27_v20  ;;  %75 = vmatmul.f32.gmra.mxu0 %v19_v21 }
  0x39   :  { %102 = vmatmul.f32.gmra.mxu2 %v28_v22  ;;  %78 = vmatmul.f32.gmra.mxu0 %v20_v23 }
  0x41   :  { %105 = vmatmul.f32.gmra.mxu2 %v29_v28  ;;  %81 = vmatmul.f32.gmra.mxu0 %v21_v29 }
  0x49   :  { %108 = vmatmul.f32.gmra.mxu2 %v30_v34  ;;  %84 = vmatmul.f32.gmra.mxu0 %v22_v35 }
  0x51   :  { %111 = vmatmul.f32.gmra.mxu2 %v31_v40  ;;  %87 = vmatmul.f32.gmra.mxu0 %v23_v41 }
  0x59   :  { %114 = vmatmul.f32.gmra.mxu2 %v32_v43  ;;  %90 = vmatmul.f32.gmra.mxu0 %v24_v44 }
  0x9e   :  { %v70_v49 = vpop.f32.mrf.mxu0 }
  0x9f   :  { %v71_v50 = vadd.f32 %v267_v48, %v70_v49 }
  0xa1   :  { %v118_v51 = vmax.f32 %v71_v50, 0.0 }
  0xa3   :  { %166 = vmatmul.f32.vlgmr.msra.gmra.mxu1 %v118_v51 }
  0xa4   :  { %v94_v52 = vpop.f32.mrf.mxu2 }
  0xa5   :  { %v95_v53 = vadd.f32 %v267_v48, %v94_v52 }
  0xa6   :  { %v73_v54 = vpop.f32.mrf.mxu0 }
  0xa7   :  { %v126_v55 = vmax.f32 %v95_v53, 0.0  ;;  %v74_v56 = vadd.f32 %v267_v48, %v73_v54 }
  0xa9   :  { %190 = vmatmul.f32.vlgmr.msra.gmra.mxu3 %v126_v55  ;;  %v119_v57 = vmax.f32 %v74_v56, 0.0 }
  0xab   :  { %169 = vmatmul.f32.gmra.mxu1 %v119_v57 }
  0xac   :  { %v97_v58 = vpop.f32.mrf.mxu2 }
  0xad   :  { %v98_v59 = vadd.f32 %v267_v48, %v97_v58 }
  0xae   :  { %v76_v60 = vpop.f32.mrf.mxu0 }
  0xaf   :  { %v127_v61 = vmax.f32 %v98_v59, 0.0  ;;  %v77_v62 = vadd.f32 %v267_v48, %v76_v60 }
  0xb1   :  { %193 = vmatmul.f32.gmra.mxu3 %v127_v61  ;;  %v120_v63 = vmax.f32 %v77_v62, 0.0 }
  0xb3   :  { %172 = vmatmul.f32.gmra.mxu1 %v120_v63 }
  0xb4   :  { %v100_v0 = vpop.f32.mrf.mxu2 }
  0xb5   :  { %v101_v1 = vadd.f32 %v267_v48, %v100_v0 }
  0xb6   :  { %v79_v2 = vpop.f32.mrf.mxu0 }
  0xb7   :  { %v128_v3 = vmax.f32 %v101_v1, 0.0  ;;  %v80_v4 = vadd.f32 %v267_v48, %v79_v2 }
  0xb9   :  { %196 = vmatmul.f32.gmra.mxu3 %v128_v3  ;;  %v121_v5 = vmax.f32 %v80_v4, 0.0 }
  0xbb   :  { %175 = vmatmul.f32.gmra.mxu1 %v121_v5 }
  0xbc   :  { %v103_v6 = vpop.f32.mrf.mxu2 }
  0xbd   :  { %v104_v7 = vadd.f32 %v267_v48, %v103_v6 }
  0xbe   :  { %v82_v8 = vpop.f32.mrf.mxu0 }
  0xbf   :  { %v129_v9 = vmax.f32 %v104_v7, 0.0  ;;  %v83_v10 = vadd.f32 %v267_v48, %v82_v8 }
  0xc1   :  { %199 = vmatmul.f32.gmra.mxu3 %v129_v9  ;;  %v122_v11 = vmax.f32 %v83_v10, 0.0 }
  0xc3   :  { %178 = vmatmul.f32.gmra.mxu1 %v122_v11 }
  0xc4   :  { %v106_v12 = vpop.f32.mrf.mxu2 }
  0xc5   :  { %v107_v13 = vadd.f32 %v267_v48, %v106_v12 }
  0xc6   :  { %v85_v14 = vpop.f32.mrf.mxu0 }
  0xc7   :  { %v130_v15 = vmax.f32 %v107_v13, 0.0  ;;  %v86_v16 = vadd.f32 %v267_v48, %v85_v14 }
  0xc9   :  { %202 = vmatmul.f32.gmra.mxu3 %v130_v15  ;;  %v123_v17 = vmax.f32 %v86_v16, 0.0 }
  0xcb   :  { %181 = vmatmul.f32.gmra.mxu1 %v123_v17 }
  0xcc   :  { %v109_v18 = vpop.f32.mrf.mxu2 }
  0xcd   :  { %v110_v19 = vadd.f32 %v267_v48, %v109_v18 }
  0xce   :  { %v88_v20 = vpop.f32.mrf.mxu0 }
  0xcf   :  { %v131_v21 = vmax.f32 %v110_v19, 0.0  ;;  %v89_v22 = vadd.f32 %v267_v48, %v88_v20 }
  0xd1   :  { %205 = vmatmul.f32.gmra.mxu3 %v131_v21  ;;  %v124_v23 = vmax.f32 %v89_v22, 0.0 }
  0xd3   :  { %184 = vmatmul.f32.gmra.mxu1 %v124_v23 }
  0xd4   :  { %v112_v24 = vpop.f32.mrf.mxu2 }
  0xd5   :  { %v113_v25 = vadd.f32 %v267_v48, %v112_v24 }
  0xd6   :  { %v91_v26 = vpop.f32.mrf.mxu0 }
  0xd7   :  { %v132_v27 = vmax.f32 %v113_v25, 0.0  ;;  %v92_v28 = vadd.f32 %v267_v48, %v91_v26 }
  0xd9   :  { %208 = vmatmul.f32.gmra.mxu3 %v132_v27  ;;  %v125_v29 = vmax.f32 %v92_v28, 0.0 }
  0xdb   :  { %187 = vmatmul.f32.gmra.mxu1 %v125_v29 }
  0xdc   :  { %v115_v30 = vpop.f32.mrf.mxu2 }
  0xdd   :  { %v116_v31 = vadd.f32 %v267_v48, %v115_v30 }
  0xdf   :  { %v133_v32 = vmax.f32 %v116_v31, 0.0 }
  0xe1   :  { %211 = vmatmul.f32.gmra.mxu3 %v133_v32 }
 0x120   :  { %v167_v33 = vpop.f32.mrf.mxu1 }
 0x121   :  { %215 = vst [vmem:[%s492_s4] sm:$0xff] %v167_v33 }
 0x128   :  { %v170_v34 = vpop.f32.mrf.mxu1 }
 0x129   :  { %216 = vst [vmem:[%s492_s4 + $0x8] sm:$0xff] %v170_v34 }
 0x12c   :  { %v191_v35 = vpop.f32.mrf.mxu3 }
 0x12d   :  { %223 = vst [vmem:[%s492_s4 + $0x40] sm:$0xff] %v191_v35 }
 0x130   :  { %v173_v36 = vpop.f32.mrf.mxu1 }
 0x131   :  { %217 = vst [vmem:[%s492_s4 + $0x10] sm:$0xff] %v173_v36 }
 0x134   :  { %v194_v37 = vpop.f32.mrf.mxu3 }
 0x135   :  { %224 = vst [vmem:[%s492_s4 + $0x48] sm:$0xff] %v194_v37 }
 0x138   :  { %v176_v38 = vpop.f32.mrf.mxu1 }
 0x139   :  { %218 = vst [vmem:[%s492_s4 + $0x18] sm:$0xff] %v176_v38 }
 0x13c   :  { %v197_v39 = vpop.f32.mrf.mxu3 }
 0x13d   :  { %225 = vst [vmem:[%s492_s4 + $0x50] sm:$0xff] %v197_v39 }
 0x140   :  { %v179_v40 = vpop.f32.mrf.mxu1 }
 0x141   :  { %219 = vst [vmem:[%s492_s4 + $0x20] sm:$0xff] %v179_v40 }
 0x144   :  { %v200_v41 = vpop.f32.mrf.mxu3 }
 0x145   :  { %226 = vst [vmem:[%s492_s4 + $0x58] sm:$0xff] %v200_v41 }
 0x148   :  { %v182_v42 = vpop.f32.mrf.mxu1 }
 0x149   :  { %220 = vst [vmem:[%s492_s4 + $0x28] sm:$0xff] %v182_v42 }
 0x14c   :  { %v203_v43 = vpop.f32.mrf.mxu3 }
 0x14d   :  { %227 = vst [vmem:[%s492_s4 + $0x60] sm:$0xff] %v203_v43 }
 0x150   :  { %v185_v44 = vpop.f32.mrf.mxu1 }
 0x151   :  { %221 = vst [vmem:[%s492_s4 + $0x30] sm:$0xff] %v185_v44 }
 0x154   :  { %v206_v45 = vpop.f32.mrf.mxu3 }
 0x155   :  { %228 = vst [vmem:[%s492_s4 + $0x68] sm:$0xff] %v206_v45 }
 0x158   :  { %v188_v46 = vpop.f32.mrf.mxu1 }
 0x159   :  { %222 = vst [vmem:[%s492_s4 + $0x38] sm:$0xff] %v188_v46 }
 0x15c   :  { %v209_v47 = vpop.f32.mrf.mxu3 }
 0x15d   :  { %229 = vst [vmem:[%s492_s4 + $0x70] sm:$0xff] %v209_v47 }
 0x164   :  { %v212_v48 = vpop.f32.mrf.mxu3 }
 0x165   :  { %230 = vst [vmem:[%s492_s4 + $0x78] sm:$0xff] %v212_v48 }

</bundles_post_ra>
